<compile_context>
chip_gen: v7x
topology: tpu7x:2x2x1
jax: 0.10.0
libtpu: 0.0.40
codegen_flags: <defaults>
</compile_context>

<pallas_src>
import functools

import jax
import jax.numpy as jnp
from jax import lax
from jax.experimental import pallas as pl
from jax.experimental.pallas import tpu as pltpu


_EPS = 1e-10


def _round_up(x, m):
    return ((x + m - 1) // m) * m


def _round_down(x, m):
    return (x // m) * m


def _cdiv(a, b):
    return -(-a // b)


def _budgets():
    """Generation-aware (target_block_bytes, vmem_limit_bytes)."""
    vmem_cap = None
    try:
        info = pltpu.get_tpu_info()
        vmem_cap = getattr(info, "vmem_capacity_bytes", None)
    except Exception:
        vmem_cap = None
    if vmem_cap is None:
        vmem_cap = 64 << 20  # conservative fallback: assume v7x-class per-TC VMEM
    if vmem_cap >= (96 << 20):
        # v5e / v6e: 128 MiB physical VMEM -> big fused blocks, push the fused
        # cutoff out to ~512x512 f32 planes.  4 streams x 2 buffers x 6 MiB = 48 MiB.
        return 6 << 20, 80 << 20
    # v7x-class: 64 MiB per TensorCore -> smaller blocks so double-buffering of
    # 4 streams (24 MiB) plus compiler scratch stays well under the cap.
    return 3 << 20, 36 << 20


def _fast_reciprocal(d):
    """EUP approx seed (idle slot in this HBM-bound kernel) + 2 Newton steps."""
    r = pl.reciprocal(d, approx=True)
    r = r * (2.0 - d * r)
    r = r * (2.0 - d * r)
    return r


# ---------------------------------------------------------------------------
# Kernels
# ---------------------------------------------------------------------------

def _ca_fused_kernel(x1_ref, x2_ref, o1_ref, o2_ref, *, inv_hw, eps):
    """Single pass: one (row_tile, HW) block per step, full spatial plane resident."""
    x1 = x1_ref[...]
    x2 = x2_ref[...]

    # AdaptiveAvgPool2d(1): lane-axis reduce with f32 accumulation (column-only f32).
    ca1 = jnp.sum(x1, axis=-1, keepdims=True, dtype=jnp.float32) * inv_hw
    ca2 = jnp.sum(x2, axis=-1, keepdims=True, dtype=jnp.float32) * inv_hw

    # Bit-faithful to the PyTorch module: exp(ca_i) / (exp(ca1) + exp(ca2) + eps).
    e1 = jnp.exp(ca1)
    e2 = jnp.exp(ca2)
    inv_den = _fast_reciprocal(e1 + e2 + eps)

    mask1 = (e1 * inv_den).astype(o1_ref.dtype)
    mask2 = (e2 * inv_den).astype(o2_ref.dtype)

    # Row-broadcast multiply in the native dtype (no full-tile f32 upcast).
    o1_ref[...] = mask1 * x1
    o2_ref[...] = mask2 * x2


def _ca_mask_kernel(x1_ref, x2_ref, m1_ref, m2_ref, *, hw, hw_tile, inv_hw, eps, ragged):
    """Two-pass, pass 1: accumulate row sums over HW tiles, finalize into masks."""
    j = pl.program_id(1)

    @pl.when(j == 0)
    def _init():
        m1_ref[...] = jnp.zeros_like(m1_ref)
        m2_ref[...] = jnp.zeros_like(m2_ref)

    x1 = x1_ref[...]
    x2 = x2_ref[...]
    if ragged:
        # The last HW block extends past the true spatial extent; zero the
        # out-of-range lanes so they don't pollute the row sums.  (VPU compare +
        # select is free filler in this HBM-bound kernel.)
        lane = lax.broadcasted_iota(jnp.int32, x1.shape, dimension=1)
        valid = (lane + j * hw_tile) < hw
        zero1 = jnp.zeros((), x1.dtype)
        zero2 = jnp.zeros((), x2.dtype)
        x1 = jnp.where(valid, x1, zero1)
        x2 = jnp.where(valid, x2, zero2)

    m1_ref[...] += jnp.sum(x1, axis=-1, keepdims=True, dtype=jnp.float32)
    m2_ref[...] += jnp.sum(x2, axis=-1, keepdims=True, dtype=jnp.float32)

    @pl.when(j == pl.num_programs(1) - 1)
    def _finalize():
        ca1 = m1_ref[...] * inv_hw
        ca2 = m2_ref[...] * inv_hw
        e1 = jnp.exp(ca1)
        e2 = jnp.exp(ca2)
        inv_den = _fast_reciprocal(e1 + e2 + eps)
        m1_ref[...] = e1 * inv_den
        m2_ref[...] = e2 * inv_den


def _ca_apply_kernel(m1_ref, m2_ref, x1_ref, x2_ref, o1_ref, o2_ref):
    """Two-pass, pass 2: row-broadcast mask multiply in the native dtype."""
    o1_ref[...] = m1_ref[...].astype(o1_ref.dtype) * x1_ref[...]
    o2_ref[...] = m2_ref[...].astype(o2_ref.dtype) * x2_ref[...]


# ---------------------------------------------------------------------------
# Tiling heuristics (no physical padding anywhere; ragged last blocks allowed)
# ---------------------------------------------------------------------------

def _pick_row_tiling(rows, hw, itemsize, sublane, target_block_bytes):
    """Fused path: fill ~target bytes per block, keep >=2 (even) row steps where
    possible (v7x dual TensorCore + DMA pipelining), no row padding."""
    if rows <= sublane:
        return rows, 1                         # block row dim == array dim
    row_bytes = hw * itemsize
    max_rows = max(sublane, _round_down(target_block_bytes // row_bytes, sublane))
    n_steps = max(_cdiv(rows, max_rows), 2)    # >=2 steps -> both v7x TCs get work
    if n_steps % 2:
        n_steps += 1                           # even step count -> no idle TC on the tail
    row_tile = min(_round_up(_cdiv(rows, n_steps), sublane), max_rows)
    if row_tile >= rows:
        return rows, 1
    return row_tile, _cdiv(rows, row_tile)


def _pick_2pass_tiling(rows, hw, itemsize, sublane, target_block_bytes):
    """Two-pass path: modest row tile (keeps >=2 row steps when rows allow),
    HW tiles re-balanced so the ragged tail wastes <128 lanes per tile."""
    if rows < sublane:
        row_tile = rows                        # block row dim == array dim
    else:
        row_tile = min(64, max(sublane, _round_down(rows // 2, sublane)))
    hw_tile_max = max(128, _round_down(target_block_bytes // (row_tile * itemsize), 128))
    n_hw = _cdiv(hw, hw_tile_max)
    hw_tile = _round_up(_cdiv(hw, n_hw), 128)
    return row_tile, hw_tile


# ---------------------------------------------------------------------------
# Wrapper
# ---------------------------------------------------------------------------

def channel_attention_block(x1, x2, *, target_block_bytes=None, vmem_limit_bytes=None):
    """Pallas TPU implementation of ChannelAttentionBlock.forward (NCHW in/out)."""
    assert x1.shape == x2.shape and x1.dtype == x2.dtype
    n, c, h, w = x1.shape
    rows, hw = n * c, h * w
    dtype = x1.dtype
    itemsize = jnp.dtype(dtype).itemsize
    sublane = max(8, 32 // itemsize)           # 8 (f32), 16 (bf16), 32 (int8)
    inv_hw = 1.0 / float(hw)

    auto_target, auto_limit = _budgets()
    target = int(target_block_bytes) if target_block_bytes else auto_target
    vmem_limit = int(vmem_limit_bytes) if vmem_limit_bytes else auto_limit

    # Free reshapes: NCHW (contiguous) <-> (N*C, H*W).
    x1_2d = x1.reshape(rows, hw)
    x2_2d = x2.reshape(rows, hw)

    if sublane * hw * itemsize <= target:
        # ----- fused single pass: a sublane-high full-HW block fits the budget -----
        row_tile, n_steps = _pick_row_tiling(rows, hw, itemsize, sublane, target)
        spec = pl.BlockSpec((row_tile, hw), lambda i: (i, 0))
        out1, out2 = pl.pallas_call(
            functools.partial(_ca_fused_kernel, inv_hw=inv_hw, eps=_EPS),
            out_shape=(
                jax.ShapeDtypeStruct((rows, hw), dtype),
                jax.ShapeDtypeStruct((rows, hw), dtype),
            ),
            grid_spec=pltpu.PrefetchScalarGridSpec(
                num_scalar_prefetch=0,
                grid=(n_steps,),
                in_specs=[spec, spec],
                out_specs=[spec, spec],
            ),
            compiler_params=pltpu.CompilerParams(
                dimension_semantics=("parallel",),
                vmem_limit_bytes=vmem_limit,
            ),
        )(x1_2d, x2_2d)
    else:
        # ----- two-pass path: very large spatial planes, HW tiled as a reduction -----
        row_tile, hw_tile = _pick_2pass_tiling(rows, hw, itemsize, sublane, target)
        n_row = _cdiv(rows, row_tile)
        n_hw = _cdiv(hw, hw_tile)
        ragged = (hw % hw_tile) != 0

        x_spec = pl.BlockSpec((row_tile, hw_tile), lambda i, j: (i, j))
        m_spec = pl.BlockSpec((row_tile, 1), lambda i, j: (i, 0))

        # Pass 1: per-row means -> softmax gates, (rows, 1) f32 each.
        m1, m2 = pl.pallas_call(
            functools.partial(_ca_mask_kernel, hw=hw, hw_tile=hw_tile,
                              inv_hw=inv_hw, eps=_EPS, ragged=ragged),
            out_shape=(
                jax.ShapeDtypeStruct((rows, 1), jnp.float32),
                jax.ShapeDtypeStruct((rows, 1), jnp.float32),
            ),
            grid_spec=pltpu.PrefetchScalarGridSpec(
                num_scalar_prefetch=0,
                grid=(n_row, n_hw),
                in_specs=[x_spec, x_spec],
                out_specs=[m_spec, m_spec],
            ),
            compiler_params=pltpu.CompilerParams(
                dimension_semantics=("parallel", "arbitrary"),
                vmem_limit_bytes=vmem_limit,
            ),
        )(x1_2d, x2_2d)

        # Pass 2: mask * x, fully parallel grid.
        out1, out2 = pl.pallas_call(
            _ca_apply_kernel,
            out_shape=(
                jax.ShapeDtypeStruct((rows, hw), dtype),
                jax.ShapeDtypeStruct((rows, hw), dtype),
            ),
            grid_spec=pltpu.PrefetchScalarGridSpec(
                num_scalar_prefetch=0,
                grid=(n_row, n_hw),
                in_specs=[m_spec, m_spec, x_spec, x_spec],
                out_specs=[x_spec, x_spec],
            ),
            compiler_params=pltpu.CompilerParams(
                dimension_semantics=("parallel", "parallel"),
                vmem_limit_bytes=vmem_limit,
            ),
        )(m1, m2, x1_2d, x2_2d)

    return out1.reshape(n, c, h, w), out2.reshape(n, c, h, w)


# ---------------------------------------------------------------------------
# Reference + self-test
# ---------------------------------------------------------------------------

def _reference(x1, x2):
    eps = 1e-10
    x1 = x1.astype(jnp.float32)
    x2 = x2.astype(jnp.float32)
    ca1 = jnp.mean(x1, axis=(2, 3), keepdims=True)
    ca2 = jnp.mean(x2, axis=(2, 3), keepdims=True)
    e1, e2 = jnp.exp(ca1), jnp.exp(ca2)
    mask1 = e1 / (e2 + e1 + eps)
    mask2 = e2 / (e1 + e2 + eps)
    return mask1 * x1, mask2 * x2


def _check(y1, y2, x1, x2, atol, rtol):
    r1, r2 = _reference(x1, x2)
    assert jnp.allclose(y1.astype(jnp.float32), r1, atol=atol, rtol=rtol)
    assert jnp.allclose(y2.astype(jnp.float32), r2, atol=atol, rtol=rtol)


if __name__ == "__main__":
    key = jax.random.PRNGKey(0)
    ks = jax.random.split(key, 10)

    # Case 1: canonical small NCHW, fused single-pass path (HW multiple of 128).
    x1 = jax.random.normal(ks[0], (2, 4, 16, 16), dtype=jnp.float32)
    x2 = jax.random.normal(ks[1], (2, 4, 16, 16), dtype=jnp.float32)
    y1, y2 = channel_attention_block(x1, x2)
    jax.block_until_ready((y1, y2))
    _check(y1, y2, x1, x2, atol=1e-5, rtol=1e-5)

    # Case 2: odd spatial size (HW=225, not a multiple of 128), fused path with
    # block last dim == full HW (no wrapper-side padding / slicing).
    x3 = jax.random.normal(ks[2], (2, 4, 15, 15), dtype=jnp.float32)
    x4 = jax.random.normal(ks[3], (2, 4, 15, 15), dtype=jnp.float32)
    y3, y4 = channel_attention_block(x3, x4)
    jax.block_until_ready((y3, y4))
    _check(y3, y4, x3, x4, atol=1e-5, rtol=1e-5)

    # Case 3: tiny block budget forces the two-pass HW-tiled reduction path and
    # exercises the ragged-lane masking of the row sums.
    y5, y6 = channel_attention_block(x3, x4, target_block_bytes=4096)
    jax.block_until_ready((y5, y6))
    _check(y5, y6, x3, x4, atol=1e-5, rtol=1e-5)

    # Case 4: more rows -> multi-step (even) parallel row grid in the fused path.
    x7 = jax.random.normal(ks[4], (2, 32, 32, 32), dtype=jnp.float32)
    x8 = jax.random.normal(ks[5], (2, 32, 32, 32), dtype=jnp.float32)
    y7, y8 = channel_attention_block(x7, x8)
    jax.block_until_ready((y7, y8))
    _check(y7, y8, x7, x8, atol=1e-5, rtol=1e-5)

    # Case 5: bf16 inputs (sublane packing = 16, mask quantized to bf16).
    xb1 = jax.random.normal(ks[6], (2, 6, 16, 16), dtype=jnp.bfloat16)
    xb2 = jax.random.normal(ks[7], (2, 6, 16, 16), dtype=jnp.bfloat16)
    yb1, yb2 = channel_attention_block(xb1, xb2)
    jax.block_until_ready((yb1, yb2))
    _check(yb1, yb2, xb1, xb2, atol=5e-2, rtol=5e-2)

    print("KERNEL_OK")
</pallas_src>

<mosaic_0001>
module attributes {stable_mosaic.version = 11 : i64} {
  func.func @_ca_fused_kernel(%arg0: i32, %arg1: memref<8x256xf32, #tpu.memory_space<vmem>>, %arg2: memref<8x256xf32, #tpu.memory_space<vmem>>, %arg3: memref<8x256xf32, #tpu.memory_space<vmem>>, %arg4: memref<8x256xf32, #tpu.memory_space<vmem>>) attributes {dimension_semantics = [#tpu.dimension_semantics<parallel>], iteration_bounds = array<i64: 1>, scalar_prefetch = 0 : i64, scratch_operands = 0 : i64, tpu.core_type = #tpu.core_type<tc>, window_params = [{transform_indices = @transform_0, window_bounds = array<i64: 8, 256>}, {transform_indices = @transform_1, window_bounds = array<i64: 8, 256>}, {transform_indices = @transform_2, window_bounds = array<i64: 8, 256>}, {transform_indices = @transform_3, window_bounds = array<i64: 8, 256>}]} {
    %c0 = arith.constant 0 : index
    %c0_0 = arith.constant 0 : index
    %0 = vector.load %arg1[%c0, %c0_0] : memref<8x256xf32, #tpu.memory_space<vmem>>, vector<8x256xf32>
    %c0_1 = arith.constant 0 : index
    %c0_2 = arith.constant 0 : index
    %1 = vector.load %arg2[%c0_1, %c0_2] : memref<8x256xf32, #tpu.memory_space<vmem>>, vector<8x256xf32>
    %cst = arith.constant dense<0.000000e+00> : vector<8xf32>
    %2 = vector.multi_reduction <add>, %0, %cst [1] : vector<8x256xf32> to vector<8xf32>
    %3 = vector.shape_cast %2 : vector<8xf32> to vector<8x1xf32>
    %cst_3 = arith.constant 3.906250e-03 : f32
    %4 = vector.broadcast %cst_3 : f32 to vector<8x1xf32>
    %5 = arith.mulf %3, %4 : vector<8x1xf32>
    %cst_4 = arith.constant dense<0.000000e+00> : vector<8xf32>
    %6 = vector.multi_reduction <add>, %1, %cst_4 [1] : vector<8x256xf32> to vector<8xf32>
    %7 = vector.shape_cast %6 : vector<8xf32> to vector<8x1xf32>
    %cst_5 = arith.constant 3.906250e-03 : f32
    %8 = vector.broadcast %cst_5 : f32 to vector<8x1xf32>
    %9 = arith.mulf %7, %8 : vector<8x1xf32>
    %10 = math.exp %5 : vector<8x1xf32>
    %11 = math.exp %9 : vector<8x1xf32>
    %12 = arith.addf %10, %11 : vector<8x1xf32>
    %cst_6 = arith.constant 1.000000e-10 : f32
    %13 = vector.broadcast %cst_6 : f32 to vector<8x1xf32>
    %14 = arith.addf %12, %13 : vector<8x1xf32>
    %15 = tpu.reciprocal %14 {approx = true} : vector<8x1xf32> -> vector<8x1xf32>
    %16 = arith.mulf %14, %15 : vector<8x1xf32>
    %cst_7 = arith.constant 2.000000e+00 : f32
    %17 = vector.broadcast %cst_7 : f32 to vector<8x1xf32>
    %18 = arith.subf %17, %16 : vector<8x1xf32>
    %19 = arith.mulf %15, %18 : vector<8x1xf32>
    %20 = arith.mulf %14, %19 : vector<8x1xf32>
    %cst_8 = arith.constant 2.000000e+00 : f32
    %21 = vector.broadcast %cst_8 : f32 to vector<8x1xf32>
    %22 = arith.subf %21, %20 : vector<8x1xf32>
    %23 = arith.mulf %19, %22 : vector<8x1xf32>
    %24 = arith.mulf %10, %23 : vector<8x1xf32>
    %25 = arith.mulf %11, %23 : vector<8x1xf32>
    %26 = vector.broadcast %24 : vector<8x1xf32> to vector<8x256xf32>
    %27 = arith.mulf %26, %0 : vector<8x256xf32>
    %c0_9 = arith.constant 0 : index
    %c0_10 = arith.constant 0 : index
    %28 = vector.load %arg3[%c0_9, %c0_10] : memref<8x256xf32, #tpu.memory_space<vmem>>, vector<8x256xf32>
    tpu.vector_store %arg3[%c0_9, %c0_10], %27 {strides = array<i32>} : memref<8x256xf32, #tpu.memory_space<vmem>>, vector<8x256xf32>,
    %29 = vector.broadcast %25 : vector<8x1xf32> to vector<8x256xf32>
    %30 = arith.mulf %29, %1 : vector<8x256xf32>
    %c0_11 = arith.constant 0 : index
    %c0_12 = arith.constant 0 : index
    %31 = vector.load %arg4[%c0_11, %c0_12] : memref<8x256xf32, #tpu.memory_space<vmem>>, vector<8x256xf32>
    tpu.vector_store %arg4[%c0_11, %c0_12], %30 {strides = array<i32>} : memref<8x256xf32, #tpu.memory_space<vmem>>, vector<8x256xf32>,
    return
  }
  func.func @transform_0(%arg0: i32) -> (i32, i32) {
    %c0_i32 = arith.constant 0 : i32
    %c0_i32_0 = arith.constant 0 : i32
    return %arg0, %c0_i32 : i32, i32
  }
  func.func @transform_1(%arg0: i32) -> (i32, i32) {
    %c0_i32 = arith.constant 0 : i32
    %c0_i32_0 = arith.constant 0 : i32
    return %arg0, %c0_i32 : i32, i32
  }
  func.func @transform_2(%arg0: i32) -> (i32, i32) {
    %c0_i32 = arith.constant 0 : i32
    %c0_i32_0 = arith.constant 0 : i32
    return %arg0, %c0_i32 : i32, i32
  }
  func.func @transform_3(%arg0: i32) -> (i32, i32) {
    %c0_i32 = arith.constant 0 : i32
    %c0_i32_0 = arith.constant 0 : i32
    return %arg0, %c0_i32 : i32, i32
  }
}

</mosaic_0001>

<bundles_post_ra>
// kernel: tpu_custom_call.1
= control target key start
LH: loop header
LB: loop body
LE: loop exit
PB: predicated region body
PF: predicated region fallthrough
CT: control target
= control target key end

     0   :  { %9 = vsyncpa [#allocation3], 0  ;;  %s289_s0 = inlined_call_operand.hbm [shape: f32[8,256], index: 0, kind: input, shape index: {}]   ;;  %s290_s1 = inlined_call_operand.hbm [shape: f32[8,256], index: 1, kind: input, shape index: {}]   ;;  %s291_s2 = inlined_call_operand.hbm [shape: f32[8,256], index: 2, kind: output, shape index: {0}]   ;;  %s292_s3 = inlined_call_operand.hbm [shape: f32[8,256], index: 3, kind: output, shape index: {1}]  }
   0x1   :  { %10 = vsyncpa [#allocation6], 0 }
   0x2   :  { %11 = vsyncpa [#allocation4], 0 }
   0x3   :  { %12 = vsyncpa [#allocation9], 0  ;;  %s210_s12 = smov [#allocation2]   ;;  %s211_s14 = smov [#allocation5]  }
   0x4   :  { %s19_s13 = sshll.u32 %s210_s12, 4  ;;  %s29_s15 = sshll.u32 %s211_s14, 4  ;;  %s20_s13 = int_to_ptr.vmem [resolvable:$true] %s19_s13  ;;  %s30_s15 = int_to_ptr.vmem [resolvable:$true] %s29_s15 }
   0x5   :  { %s114_s18 = scalar_lea.hbm %s289_s0, 256 }
   0x6   :  { %p115_p0 = scmp.ne.s32.totalorder %s289_s0, %s114_s18  ;;  %p118_p1 = scmp.lt.u32.totalorder %s114_s18, %s289_s0 }
   0x8   :  { %p120_p2 = pnand %p118_p1, %p115_p0 }
   0xa   :  { %123 = shalt.err (!%p120_p2)
}
   0xb   :  { %s124_s23 = scalar_lea.vmem %s20_s13, 256  ;;  %p129_p4 = scmp.lt.s32.totalorder %s20_s13, %s20_s13 }
   0xc   :  { %p125_p3 = scmp.ne.s32.totalorder %s20_s13, %s124_s23  ;;  %p130_p5 = scmp.lt.s32.totalorder %s124_s23, %s124_s23 }
   0xe   :  { %p131_p6 = por %p130_p5, %p129_p4 }
  0x10   :  { %p132_p7 = pnand %p131_p6, %p125_p3 }
  0x12   :  { %135 = shalt.err (!%p132_p7)
}
  0x13   :  { %22 = dma.hbm_to_vmem [thread:$0]  %s289_s0, 256, %s20_s13, [#allocation3]  }
  0x14   :  { %s136_s28 = scalar_lea.hbm %s290_s1, 256 }
  0x15   :  { %p137_p8 = scmp.ne.s32.totalorder %s290_s1, %s136_s28  ;;  %p140_p9 = scmp.lt.u32.totalorder %s136_s28, %s290_s1 }
  0x17   :  { %p142_p10 = pnand %p140_p9, %p137_p8 }
  0x19   :  { %145 = shalt.err (!%p142_p10)
}
  0x1a   :  { %s146_s6 = scalar_lea.vmem %s30_s15, 256  ;;  %p151_p12 = scmp.lt.s32.totalorder %s30_s15, %s30_s15 }
  0x1b   :  { %p147_p11 = scmp.ne.s32.totalorder %s30_s15, %s146_s6  ;;  %p152_p13 = scmp.lt.s32.totalorder %s146_s6, %s146_s6 }
  0x1d   :  { %p153_p0 = por %p152_p13, %p151_p12 }
  0x1f   :  { %p154_p1 = pnand %p153_p0, %p147_p11 }
  0x21   :  { %157 = shalt.err (!%p154_p1)
}
  0x22   :  { %32 = dma.hbm_to_vmem [thread:$0]  %s290_s1, 256, %s30_s15, [#allocation6]  }
  0x23   :  { %202 = dma.done.wait [#allocation3], 256  }
  0x24   :  { %203 = vsyncadd [#allocation3], 4294967040 }
  0x25   :  { %204 = dma.done.wait [#allocation6], 256  }
  0x26   :  { %205 = vsyncadd [#allocation6], 4294967040  ;;  %v39_v0 = vld [vmem:[#allocation2] sm:$0xff]  ;;  %v40_v1 = vld [vmem:[#allocation2 + $0x8] sm:$0xff]  ;;  %s212_s1 = smov [#allocation7]   ;;  %s213_s9 = smov [#allocation8]  }
  0x27   :  { %v41_v2 = vld [vmem:[#allocation5] sm:$0xff]  ;;  %v43_v3 = vadd.f32 %v40_v1, %v39_v0  ;;  %v42_v4 = vld [vmem:[#allocation5 + $0x8] sm:$0xff]  ;;  %s80_s8 = sshll.u32 %s212_s1, 4  ;;  %s90_s10 = sshll.u32 %s213_s9, 4  ;;  %s81_s8 = int_to_ptr.vmem [resolvable:$true] %s80_s8  ;;  %s258_s10 = int_to_ptr.vmem [resolvable:$true] %s90_s10 }
  0x28   :  { %v47_v5 = vadd.f32 %v42_v4, %v41_v2  ;;  %s158_s11 = scalar_lea.vmem %s81_s8, 256  ;;  %p163_p3 = scmp.lt.s32.totalorder %s81_s8, %s81_s8 }
  0x29   :  { %44 = vadd.xlane.f32.xlu0 %v43_v3  ;;  %p159_p2 = scmp.ne.s32.totalorder %s81_s8, %s158_s11  ;;  %p164_p4 = scmp.lt.s32.totalorder %s158_s11, %s158_s11 }
  0x2b   :  { %p165_p5 = por %p164_p4, %p163_p3 }
  0x2d   :  { %48 = vadd.xlane.f32.xlu0 %v47_v5  ;;  %p166_p6 = pnand %p165_p5, %p159_p2 }
  0xb6   :  { %v45_v6 = vpop.xlane.xlu0 %44 }
  0xb7   :  { %v46_v7 = vmul.f32 0.00390625, %v45_v6 }
  0xb9   :  { %v51_v8 = vmul.f32 1.442695, %v46_v7 }
  0xba   :  { %v49_v9 = vpop.xlane.xlu0 %48 }
  0xbb   :  { %v50_v10 = vmul.f32 0.00390625, %v49_v9  ;;  %108 = vpow2.f32 %v51_v8 }
  0xbd   :  { %v53_v11 = vmul.f32 1.442695, %v50_v10 }
  0xbf   :  { %110 = vpow2.f32 %v53_v11 }
  0xc5   :  { %v109_v12 = vpop.eup %108 }
  0xc9   :  { %v111_v13 = vpop.eup %110 }
  0xca   :  { %v55_v14 = vadd.f32 %v111_v13, %v109_v12 }
  0xcc   :  { %v56_v15 = vadd.f32 1e-10, %v55_v14 }
  0xce   :  { %112 = vrcp.f32 %v56_v15 }
  0xd8   :  { %v113_v16 = vpop.eup %112 }
  0xd9   :  { %v58_v17 = vmul.f32 %v113_v16, %v56_v15 }
  0xdb   :  { %v59_v18 = vsub.f32 2.0, %v58_v17 }
  0xdd   :  { %v60_v19 = vmul.f32 %v113_v16, %v59_v18 }
  0xdf   :  { %v61_v20 = vmul.f32 %v60_v19, %v56_v15 }
  0xe1   :  { %v62_v21 = vsub.f32 2.0, %v61_v20 }
  0xe3   :  { %v63_v22 = vmul.f32 %v62_v21, %v60_v19 }
  0xe5   :  { %v64_v23 = vmul.f32 %v109_v12, %v63_v22  ;;  %v65_v24 = vmul.f32 %v111_v13, %v63_v22 }
  0xe7   :  { %v66_v25 = vmul.f32 %v64_v23, %v39_v0  ;;  %v67_v26 = vmul.f32 %v64_v23, %v40_v1  ;;  %v70_v27 = vmul.f32 %v65_v24, %v41_v2  ;;  %v71_v28 = vmul.f32 %v65_v24, %v42_v4 }
  0xe9   :  { %68 = vst [vmem:[#allocation7] sm:$0xff] %v66_v25  ;;  %69 = vst [vmem:[#allocation7 + $0x8] sm:$0xff] %v67_v26 }
  0xea   :  { %72 = vst [vmem:[#allocation8] sm:$0xff] %v70_v27  ;;  %73 = vst [vmem:[#allocation8 + $0x8] sm:$0xff] %v71_v28 }
  0xeb   :  { %169 = shalt.err (!%p166_p6)
}
  0xec   :  { %s170_s14 = scalar_lea.hbm %s291_s2, 256 }
  0xed   :  { %p171_p7 = scmp.ne.s32.totalorder %s291_s2, %s170_s14  ;;  %p174_p8 = scmp.lt.u32.totalorder %s170_s14, %s291_s2 }
  0xef   :  { %p176_p9 = pnand %p174_p8, %p171_p7 }
  0xf1   :  { %179 = shalt.err (!%p176_p9)
}
  0xf2   :  { %83 = dma.vmem_to_hbm [thread:$0]  %s81_s8, 256, %s291_s2, [#allocation4]  }
  0xf3   :  { %s180_s21 = scalar_lea.vmem %s258_s10, 256  ;;  %p185_p11 = scmp.lt.s32.totalorder %s258_s10, %s258_s10 }
  0xf4   :  { %p181_p10 = scmp.ne.s32.totalorder %s258_s10, %s180_s21  ;;  %p186_p12 = scmp.lt.s32.totalorder %s180_s21, %s180_s21 }
  0xf6   :  { %p187_p13 = por %p186_p12, %p185_p11 }
  0xf8   :  { %p188_p0 = pnand %p187_p13, %p181_p10 }
  0xfa   :  { %191 = shalt.err (!%p188_p0)
}
  0xfb   :  { %s192_s24 = scalar_lea.hbm %s292_s3, 256 }
  0xfc   :  { %p193_p1 = scmp.ne.s32.totalorder %s292_s3, %s192_s24  ;;  %p196_p2 = scmp.lt.u32.totalorder %s192_s24, %s292_s3 }
  0xfe   :  { %p198_p3 = pnand %p196_p2, %p193_p1 }
 0x100   :  { %201 = shalt.err (!%p198_p3)
}
 0x101   :  { %93 = dma.vmem_to_hbm [thread:$0]  %s258_s10, 256, %s292_s3, [#allocation9]  }
 0x102   :  { %206 = dma.done.wait [#allocation4], 256  }
 0x103   :  { %207 = vsyncadd [#allocation4], 4294967040 }
 0x104   :  { %208 = dma.done.wait [#allocation9], 256  }
 0x105   :  { %209 = vsyncadd [#allocation9], 4294967040 }
 0x106   :  { %100 = vsyncpa [#allocation3], 1 }
 0x107   :  { %101 = vsyncpa [#allocation6], 1 }
 0x108   :  { %102 = vsyncpa [#allocation4], 1 }
 0x109   :  { %103 = vsyncpa [#allocation9], 1 }

</bundles_post_ra>
